<compile_context>
chip_gen: v5e
topology: v5e:2x2
jax: 0.10.0
libtpu: 0.0.40
codegen_flags: <defaults>
</compile_context>

<pallas_src>
import jax
import jax.numpy as jnp
from jax.experimental import pallas as pl
from jax.experimental.pallas import tpu as pltpu


IN_FEATURES = 7


def fused_affine_kernel(xt_ref, w_ref, b_ref, o_ref):
    """One (1, TM) output tile of y = W_fused^T x^T + b, computed on the VPU.

    xt_ref: (7, TM)  batch rows live in the lane dimension (lane-dense).
    w_ref : (7, 1)   fused weight column, broadcast across lanes.
    b_ref : (1, 1)   fused bias.
    o_ref : (1, TM)  lane-dense output tile.
    """
    prod = xt_ref[...] * w_ref[...]              # VPU elementwise, (7, TM)
    y = jnp.sum(prod, axis=0, keepdims=True)     # cheap sublane reduce -> (1, TM)
    o_ref[...] = y + b_ref[...]


def fuse_params(params):
    """Collapse the 4 activation-free Linear layers into one affine map."""
    (w1, b1), (w2, b2), (w3, b3), (w4, b4) = params
    w_f = w1 @ w2 @ w3 @ w4                            # (7, 1)
    b_f = ((b1 @ w2 + b2) @ w3 + b3) @ w4 + b4         # (1, 1)
    return w_f, b_f


def mlp_forward(x, params, *, tm=1024):
    """Pallas forward pass equivalent to l4(l3(l2(l1(x))))."""
    n, k = x.shape
    assert k == IN_FEATURES

    # Fusion could be hoisted to init time; it is ~O(7*5*3*2) flops here.
    w_f, b_f = fuse_params(params)

    # Tile size: multiple of 128 (lane width); no point tiling beyond the
    # padded batch.  Per-step VMEM ~= 2 buffers * (7+1) * tm * 4 B -> tiny.
    tm = max(128, min(tm, pl.cdiv(n, 128) * 128))
    n_pad = pl.cdiv(n, tm) * tm

    # Lane-dense layout: pad ragged batch and put rows in the lane dim.
    # Padded rows just produce b_fused and are sliced off below.
    x_t = jnp.pad(x, ((0, n_pad - n), (0, 0))).T       # (7, n_pad)

    out = pl.pallas_call(
        fused_affine_kernel,
        out_shape=jax.ShapeDtypeStruct((1, n_pad), jnp.float32),
        grid=(n_pad // tm,),
        in_specs=[
            pl.BlockSpec((IN_FEATURES, tm), lambda i: (0, i)),
            pl.BlockSpec((IN_FEATURES, 1), lambda i: (0, 0)),
            pl.BlockSpec((1, 1), lambda i: (0, 0)),
        ],
        out_specs=pl.BlockSpec((1, tm), lambda i: (0, i)),
        compiler_params=pltpu.CompilerParams(
            dimension_semantics=("parallel",)),        # shard batch over 2 TCs on v7x
    )(x_t, w_f, b_f)

    return out[0, :n].reshape(n, 1)


def init_linear(key, fan_in, fan_out):
    # Mimic PyTorch nn.Linear default init: U(-1/sqrt(fan_in), +1/sqrt(fan_in)).
    kw, kb = jax.random.split(key)
    bound = 1.0 / (fan_in ** 0.5)
    # Stored as (in, out) so forward is x @ W + b.
    w = jax.random.uniform(kw, (fan_in, fan_out), jnp.float32, -bound, bound)
    b = jax.random.uniform(kb, (1, fan_out), jnp.float32, -bound, bound)
    return w, b


def reference_forward(x, params):
    h = x
    for w, b in params:
        h = h @ w + b
    return h


if __name__ == "__main__":
    key = jax.random.PRNGKey(0)
    k_x, k1, k2, k3, k4 = jax.random.split(key, 5)

    batch = 8
    x = jax.random.normal(k_x, (batch, IN_FEATURES), jnp.float32)

    params = (
        init_linear(k1, 7, 5),
        init_linear(k2, 5, 3),
        init_linear(k3, 3, 2),
        init_linear(k4, 2, 1),
    )

    out = jax.block_until_ready(mlp_forward(x, params))
    ref = reference_forward(x, params)

    assert out.shape == (batch, 1), out.shape
    assert jnp.allclose(out, ref, atol=1e-5, rtol=1e-4), "mismatch vs reference"

    print("KERNEL_OK")
</pallas_src>

<mosaic_0001>
module attributes {stable_mosaic.version = 11 : i64} {
  func.func @fused_affine_kernel(%arg0: i32, %arg1: memref<7x128xf32, #tpu.memory_space<vmem>>, %arg2: memref<7x1xf32, #tpu.memory_space<vmem>>, %arg3: memref<1x1xf32, #tpu.memory_space<vmem>>, %arg4: memref<1x128xf32, #tpu.memory_space<vmem>>) attributes {dimension_semantics = [#tpu.dimension_semantics<parallel>], iteration_bounds = array<i64: 1>, scalar_prefetch = 0 : i64, scratch_operands = 0 : i64, tpu.core_type = #tpu.core_type<tc>, window_params = [{transform_indices = @transform_0, window_bounds = array<i64: 7, 128>}, {pipeline_mode = #tpu.pipeline_mode<synchronous>, transform_indices = @transform_1, window_bounds = array<i64: 7, 1>}, {pipeline_mode = #tpu.pipeline_mode<synchronous>, transform_indices = @transform_2, window_bounds = array<i64: 1, 1>}, {transform_indices = @transform_3, window_bounds = array<i64: 1, 128>}]} {
    %c0 = arith.constant 0 : index
    %c0_0 = arith.constant 0 : index
    %0 = vector.load %arg1[%c0, %c0_0] : memref<7x128xf32, #tpu.memory_space<vmem>>, vector<7x128xf32>
    %c0_1 = arith.constant 0 : index
    %c0_2 = arith.constant 0 : index
    %1 = vector.load %arg2[%c0_1, %c0_2] : memref<7x1xf32, #tpu.memory_space<vmem>>, vector<7x1xf32>
    %2 = vector.broadcast %1 : vector<7x1xf32> to vector<7x128xf32>
    %3 = arith.mulf %0, %2 : vector<7x128xf32>
    %cst = arith.constant dense<0.000000e+00> : vector<128xf32>
    %4 = vector.multi_reduction <add>, %3, %cst [0] : vector<7x128xf32> to vector<128xf32>
    %5 = vector.shape_cast %4 : vector<128xf32> to vector<1x128xf32>
    %c0_3 = arith.constant 0 : index
    %c0_4 = arith.constant 0 : index
    %6 = vector.load %arg3[%c0_3, %c0_4] : memref<1x1xf32, #tpu.memory_space<vmem>>, vector<1x1xf32>
    %7 = vector.broadcast %6 : vector<1x1xf32> to vector<1x128xf32>
    %8 = arith.addf %5, %7 : vector<1x128xf32>
    %c0_5 = arith.constant 0 : index
    %c0_6 = arith.constant 0 : index
    %9 = vector.load %arg4[%c0_5, %c0_6] : memref<1x128xf32, #tpu.memory_space<vmem>>, vector<1x128xf32>
    tpu.vector_store %arg4[%c0_5, %c0_6], %8 {strides = array<i32>} : memref<1x128xf32, #tpu.memory_space<vmem>>, vector<1x128xf32>,
    return
  }
  func.func @transform_0(%arg0: i32) -> (i32, i32) {
    %c0_i32 = arith.constant 0 : i32
    %c0_i32_0 = arith.constant 0 : i32
    return %c0_i32, %arg0 : i32, i32
  }
  func.func @transform_1(%arg0: i32) -> (i32, i32) {
    %c0_i32 = arith.constant 0 : i32
    %c0_i32_0 = arith.constant 0 : i32
    %c0_i32_1 = arith.constant 0 : i32
    return %c0_i32, %c0_i32_0 : i32, i32
  }
  func.func @transform_2(%arg0: i32) -> (i32, i32) {
    %c0_i32 = arith.constant 0 : i32
    %c0_i32_0 = arith.constant 0 : i32
    %c0_i32_1 = arith.constant 0 : i32
    return %c0_i32, %c0_i32_0 : i32, i32
  }
  func.func @transform_3(%arg0: i32) -> (i32, i32) {
    %c0_i32 = arith.constant 0 : i32
    %c0_i32_0 = arith.constant 0 : i32
    return %c0_i32, %arg0 : i32, i32
  }
}

</mosaic_0001>

<bundles_post_ra>
// kernel: tpu_custom_call.1
= control target key start
LH: loop header
LB: loop body
LE: loop exit
PB: predicated region body
PF: predicated region fallthrough
CT: control target
= control target key end

     0   :  { %s121_s0 = inlined_call_operand.vmem [shape: f32[7,128], index: 0, kind: input, shape index: {}]   ;;  %s122_s1 = inlined_call_operand.vmem [shape: f32[7,1], index: 1, kind: input, shape index: {}]   ;;  %s123_s2 = inlined_call_operand.<no memory space> [shape: f32[1,1], index: 2, kind: input, shape index: {}]   ;;  %s124_s3 = inlined_call_operand.hbm [shape: f32[1,128], index: 3, kind: output, shape index: {}]  }
   0x1   :  { %v8_v0 = vstv %s123_s2 }
   0x2   :  { %9 = vst [vmem:[#allocation2] sm:$0x1] %v8_v0 }
   0x3   :  { %v18_v1 = vld [vmem:[%s122_s1] sm:$0x7f]  ;;  %v87_v2 = vmov 0  }
   0x4   :  { %60 = vset.pattern.permute.xlu0 %v87_v2 }
   0x5   :  { %10 = vsyncpa [#allocation4], 0  ;;  %21 = vperm.xlu0 %60, %v18_v1   ;;  %v17_v4 = vld [vmem:[%s121_s0] sm:$0x7f]  ;;  %vm25_vm0 = vcmask 1046528   ;;  %s88_s1 = smov [#allocation3]  }
   0x6   :  { %s47_s2 = sshll.u32 %s88_s1, 4  ;;  %s49_s20 = sshll.u32 %s124_s3, 4  ;;  %s48_s2 = int_to_ptr.vmem [resolvable:$true] %s47_s2  ;;  %s50_s20 = int_to_ptr.hbm [resolvable:$true] %s49_s20 }
   0x9   :  { %v33_v3 = vld [vmem:[#allocation2] sm:$0x1] }
   0xd   :  { %36 = vperm.xlu0 %60, %v33_v3  }
  0x77   :  { %v22_v5 = vpop.permute.xlu0 %21 }
  0x78   :  { %v24_v6 = vmul.f32 %v22_v5, %v17_v4 }
  0x7a   :  { %v26_v7 = vsel %vm25_vm0, %v24_v6, 0.0 }
  0x7b   :  { %v27_v8 = vrot.slane %v26_v7, 4 }
  0x7d   :  { %v28_v9 = vadd.f32 %v27_v8, %v26_v7 }
  0x7f   :  { %v29_v10 = vrot.slane %v28_v9, 2  ;;  %v37_v12 = vpop.permute.xlu0 %36 }
  0x80   :  { %v39_v15 = vperm.slane %v37_v12, 0 }
  0x81   :  { %v30_v11 = vadd.f32 %v29_v10, %v28_v9 }
  0x83   :  { %v31_v13 = vrot.slane %v30_v11, 1 }
  0x85   :  { %v32_v14 = vadd.f32 %v31_v13, %v30_v11 }
  0x87   :  { %v40_v16 = vadd.f32 %v39_v15, %v32_v14 }
  0x89   :  { %41 = vst [vmem:[#allocation3] sm:$0x1] %v40_v16 }
  0x8a   :  { %52 = dma.vmem_to_hbm [thread:$0]  %s48_s2, 16, %s50_s20, [#allocation4]  }
  0x8b   :  { %85 = dma.done.wait [#allocation4], 16  }
  0x8c   :  { %86 = vsyncadd [#allocation4], 4294967280 }
  0x8d   :  { %57 = vsyncpa [#allocation4], 1 }

</bundles_post_ra>
